<compile_context>
chip_gen: v7x
topology: tpu7x:2x2x1
jax: 0.10.0
libtpu: 0.0.40
codegen_flags: <defaults>
</compile_context>

<pallas_src>
import functools

import numpy as np
import jax
import jax.numpy as jnp
from jax.experimental import pallas as pl
from jax.experimental.pallas import tpu as pltpu


# ----------------------------------------------------------------------------
# pltpu.roll rotate-direction probe (one tiny kernel, cached).  Guards the tap
# offsets against rotate-convention differences across jax/Mosaic versions.
# ----------------------------------------------------------------------------
@functools.lru_cache(maxsize=None)
def _roll_is_numpy_convention():
    """True iff pltpu.roll(x, s, axis)[..., i] == x[..., (i - s) % n] (np.roll)."""
    def probe(x_ref, o_ref):
        o_ref[...] = pltpu.roll(x_ref[...], 1, axis=1)

    x = jnp.tile(jnp.arange(128, dtype=jnp.float32), (8, 1))
    out = pl.pallas_call(
        probe, out_shape=jax.ShapeDtypeStruct((8, 128), jnp.float32))(x)
    v = float(out[0, 0])
    if v == 127.0:
        return True
    if v == 1.0:
        return False
    raise AssertionError(f"unexpected pltpu.roll result: out[0,0] = {v}")


# ----------------------------------------------------------------------------
# Fused Pallas kernel: entire SFE forward for one group of images per grid step.
# Activations are (C, L); L = images_per_step * (Ho+2)*(Wo+2) padded to 128.
# ----------------------------------------------------------------------------
def _sfe_kernel(hp_ref, mask_ref, wh_ref, bh_ref, wd1_ref, bd1_ref, wd2_ref,
                bd2_ref, rw1_ref, rb1_ref, rw2_ref, rb2_ref, wt_ref, bt_ref,
                o_ref, *, tap_shifts, num_res_blocks, res_scale):
    f32 = jnp.float32
    cdt = hp_ref.dtype                      # MXU input dtype (f32, or bf16)
    mask = mask_ref[...]                    # (1, L): 1 interior, 0 border/lane-pad

    def conv3x3(act, w, b):
        """act (C, L) f32 -> (C, L) f32; one K=9C MXU dot, taps via pltpu.roll."""
        a = act.astype(cdt)
        taps = [a if s == 0 else pltpu.roll(a, s, axis=1) for s in tap_shifts]
        patches = jnp.concatenate(taps, axis=0)                     # (9C, L)
        out = jnp.dot(w, patches, preferred_element_type=f32) + b   # (C, L)
        return out * mask        # re-zero conv padding + kill roll wrap-around

    # Head 3x3 (pre-gathered stride-4 im2col, lane-dense) + two 1x1 stride-2 convs.
    z = jnp.dot(wh_ref[...], hp_ref[0], preferred_element_type=f32) + bh_ref[...]
    z = jnp.maximum(z, 0.0)
    z = jnp.dot(wd1_ref[...], z.astype(cdt), preferred_element_type=f32) + bd1_ref[...]
    z = jnp.maximum(z, 0.0)
    z = jnp.dot(wd2_ref[...], z.astype(cdt), preferred_element_type=f32) + bd2_ref[...]
    z = jnp.maximum(z, 0.0) * mask          # zero the conv-padding border / tail

    x1 = z
    for i in range(num_res_blocks):         # static unroll
        inp = z
        h = jnp.maximum(conv3x3(z, rw1_ref[i], rb1_ref[i]), 0.0)
        z = conv3x3(h, rw2_ref[i], rb2_ref[i])
        if res_scale != 1.0:                # static skip of the VPU multiply
            z = z * res_scale
        z = z + inp
    z = conv3x3(z, wt_ref[...], bt_ref[...]) + x1

    o_ref[0] = z.astype(o_ref.dtype)


# ----------------------------------------------------------------------------
# Wrapper: stride-4 head im2col, transposed weight layout, lane-dense packing.
# ----------------------------------------------------------------------------
def sfe_forward(params, x_nchw, num_res_blocks, res_scale,
                compute_dtype=jnp.float32, images_per_step=None):
    """SFE forward.  x_nchw: (N, 3, H, W), H and W divisible by 4.
    Returns (N, n_feats, H//4, W//4) float32 (NCHW, like the PyTorch module)."""
    x = jnp.transpose(x_nchw, (0, 2, 3, 1)).astype(jnp.float32)    # NCHW -> NHWC
    N, H, W, Cin = x.shape
    assert H % 4 == 0 and W % 4 == 0, "H and W must be divisible by 4"
    C = params["conv_head"][0].shape[-1]
    R = num_res_blocks
    assert R >= 1
    Ho, Wo = H // 4, W // 4
    Hp, Wp = Ho + 2, Wo + 2                 # zero-padded spatial layout
    HWp = Hp * Wp

    # ---- images per grid step -------------------------------------------------
    if images_per_step is None:
        # Fill lanes, but keep >= 2 grid steps (two v7x TensorCores) and bound
        # the per-step lane extent so the (9C, L) patch buffer stays small.
        target = max(1, min(N // 2 if N >= 2 else 1, max(1, 8192 // HWp)))
        images_per_step = max(d for d in range(1, N + 1)
                              if N % d == 0 and d <= target)
    B_t = images_per_step
    assert N % B_t == 0
    G = N // B_t
    L_raw = B_t * HWp
    L = ((L_raw + 127) // 128) * 128        # lane-dense (multiple of 128)

    # ---- in-kernel 3x3 tap shifts (flat padded-spatial offsets) ----------------
    offs = [(dy - 1) * Wp + (dx - 1) for dy in range(3) for dx in range(3)]
    if _roll_is_numpy_convention():
        tap_shifts = tuple((-o) % L for o in offs)
    else:
        tap_shifts = tuple(o % L for o in offs)

    # ---- head-conv im2col at the stride-4 output grid, packed as (kh, L) -------
    xpad = jnp.pad(x, ((0, 0), (1, 1), (1, 1), (0, 0)))
    head_taps = [xpad[:, dy:dy + H:4, dx:dx + W:4, :]               # (N,Ho,Wo,Cin)
                 for dy in range(3) for dx in range(3)]
    head = jnp.concatenate(head_taps, axis=-1)                      # (N,Ho,Wo,9Cin)
    head = jnp.transpose(head, (0, 3, 1, 2))                        # (N,9Cin,Ho,Wo)
    kh_raw = 9 * Cin
    kh = ((kh_raw + 31) // 32) * 32                                 # align head K
    head = jnp.pad(head, ((0, 0), (0, kh - kh_raw), (1, 1), (1, 1)))  # (N,kh,Hp,Wp)
    head = head.reshape(G, B_t, kh, HWp).transpose(0, 2, 1, 3).reshape(G, kh, L_raw)
    head_p = jnp.pad(head, ((0, 0), (0, 0), (0, L - L_raw))).astype(compute_dtype)

    # ---- interior mask: 1 at real output pixels, 0 at border / lane padding ----
    m2 = jnp.zeros((Hp, Wp), jnp.float32).at[1:Ho + 1, 1:Wo + 1].set(1.0)
    mask = jnp.pad(jnp.tile(m2.reshape(-1), B_t), (0, L - L_raw)).reshape(1, L)

    # ---- weights in the transposed layout: out = W(Cout, K) @ act(K, L) --------
    def w3x3(w_hwio):                        # (3,3,Cin,Cout) -> (Cout, 9*Cin)
        cin, cout = w_hwio.shape[2], w_hwio.shape[3]
        return w_hwio.reshape(9 * cin, cout).T

    wh = jnp.pad(w3x3(params["conv_head"][0]),
                 ((0, 0), (0, kh - kh_raw))).astype(compute_dtype)   # (C, kh)
    bh = params["conv_head"][1].reshape(C, 1)
    wd1 = params["down1"][0].T.astype(compute_dtype)                 # (C, C)
    bd1 = params["down1"][1].reshape(C, 1)
    wd2 = params["down2"][0].T.astype(compute_dtype)
    bd2 = params["down2"][1].reshape(C, 1)
    wt = w3x3(params["conv_tail"][0]).astype(compute_dtype)          # (C, 9C)
    bt = params["conv_tail"][1].reshape(C, 1)
    rw1 = jnp.stack([w3x3(params["rbs"][i]["conv1"][0])
                     for i in range(R)]).astype(compute_dtype)       # (R, C, 9C)
    rb1 = jnp.stack([params["rbs"][i]["conv1"][1].reshape(C, 1) for i in range(R)])
    rw2 = jnp.stack([w3x3(params["rbs"][i]["conv2"][0])
                     for i in range(R)]).astype(compute_dtype)
    rb2 = jnp.stack([params["rbs"][i]["conv2"][1].reshape(C, 1) for i in range(R)])

    kernel = functools.partial(_sfe_kernel, tap_shifts=tap_shifts,
                               num_res_blocks=R, res_scale=float(res_scale))
    full2 = lambda g: (0, 0)
    full3 = lambda g: (0, 0, 0)
    out = pl.pallas_call(
        kernel,
        out_shape=jax.ShapeDtypeStruct((G, C, L), jnp.float32),
        grid=(G,),
        in_specs=[
            pl.BlockSpec((1, kh, L), lambda g: (g, 0, 0)),   # head im2col patches
            pl.BlockSpec((1, L), full2),                     # interior mask
            pl.BlockSpec((C, kh), full2),                    # head W
            pl.BlockSpec((C, 1), full2),                     # head b
            pl.BlockSpec((C, C), full2),                     # down1 W
            pl.BlockSpec((C, 1), full2),                     # down1 b
            pl.BlockSpec((C, C), full2),                     # down2 W
            pl.BlockSpec((C, 1), full2),                     # down2 b
            pl.BlockSpec((R, C, 9 * C), full3),              # res-block conv1 W
            pl.BlockSpec((R, C, 1), full3),                  # res-block conv1 b
            pl.BlockSpec((R, C, 9 * C), full3),              # res-block conv2 W
            pl.BlockSpec((R, C, 1), full3),                  # res-block conv2 b
            pl.BlockSpec((C, 9 * C), full2),                 # tail W
            pl.BlockSpec((C, 1), full2),                     # tail b
        ],
        out_specs=pl.BlockSpec((1, C, L), lambda g: (g, 0, 0)),
        compiler_params=pltpu.CompilerParams(dimension_semantics=("parallel",)),
    )(head_p, mask, wh, bh, wd1, bd1, wd2, bd2, rw1, rb1, rw2, rb2, wt, bt)

    # (G, C, L) -> NCHW interior; the kernel output is already channel-major.
    out = out[:, :, :L_raw].reshape(G, C, B_t, Hp, Wp).transpose(0, 2, 1, 3, 4)
    return out.reshape(N, C, Hp, Wp)[:, :, 1:Ho + 1, 1:Wo + 1]


# ----------------------------------------------------------------------------
# Parameter init (deterministic, PyTorch-default-like uniform)
# ----------------------------------------------------------------------------
def _init_conv(key, kh, kw, cin, cout):
    bound = 1.0 / np.sqrt(kh * kw * cin)
    k1, k2 = jax.random.split(key)
    w = jax.random.uniform(k1, (kh, kw, cin, cout), jnp.float32, -bound, bound)
    b = jax.random.uniform(k2, (cout,), jnp.float32, -bound, bound)
    return w, b


def init_sfe_params(key, num_res_blocks, n_feats):
    keys = jax.random.split(key, 4 + 2 * num_res_blocks)
    d1w, d1b = _init_conv(keys[1], 1, 1, n_feats, n_feats)
    d2w, d2b = _init_conv(keys[2], 1, 1, n_feats, n_feats)
    params = {
        "conv_head": _init_conv(keys[0], 3, 3, 3, n_feats),
        "down1": (d1w.reshape(n_feats, n_feats), d1b),
        "down2": (d2w.reshape(n_feats, n_feats), d2b),
        "rbs": [],
        "conv_tail": _init_conv(keys[3], 3, 3, n_feats, n_feats),
    }
    for i in range(num_res_blocks):
        params["rbs"].append({
            "conv1": _init_conv(keys[4 + 2 * i], 3, 3, n_feats, n_feats),
            "conv2": _init_conv(keys[5 + 2 * i], 3, 3, n_feats, n_feats),
        })
    return params


# ----------------------------------------------------------------------------
# Pure-JAX reference (for the silent correctness check)
# ----------------------------------------------------------------------------
def _ref_conv(x, w, b, stride, pad):
    y = jax.lax.conv_general_dilated(
        x, w, window_strides=(stride, stride),
        padding=((pad, pad), (pad, pad)),
        dimension_numbers=("NHWC", "HWIO", "NHWC"),
        precision=jax.lax.Precision.HIGHEST)
    return y + b


def sfe_reference(params, x_nchw, num_res_blocks, res_scale):
    n_feats = params["conv_head"][0].shape[-1]
    x = jnp.transpose(x_nchw, (0, 2, 3, 1))
    x = jax.nn.relu(_ref_conv(x, *params["conv_head"], stride=1, pad=1))
    w1 = params["down1"][0].reshape(1, 1, n_feats, n_feats)
    w2 = params["down2"][0].reshape(1, 1, n_feats, n_feats)
    x = jax.nn.relu(_ref_conv(x, w1, params["down1"][1], stride=2, pad=0))
    x = jax.nn.relu(_ref_conv(x, w2, params["down2"][1], stride=2, pad=0))
    x1 = x
    for i in range(num_res_blocks):
        h = jax.nn.relu(_ref_conv(x, *params["rbs"][i]["conv1"], stride=1, pad=1))
        h = _ref_conv(h, *params["rbs"][i]["conv2"], stride=1, pad=1)
        x = h * res_scale + x
    x = _ref_conv(x, *params["conv_tail"], stride=1, pad=1) + x1
    return jnp.transpose(x, (0, 3, 1, 2))


# ----------------------------------------------------------------------------
if __name__ == "__main__":
    num_res_blocks, n_feats, res_scale = 2, 32, 1.0
    N, H, W = 2, 32, 32

    key = jax.random.PRNGKey(0)
    kp, kx = jax.random.split(key)
    params = init_sfe_params(kp, num_res_blocks, n_feats)
    x = jax.random.normal(kx, (N, 3, H, W), jnp.float32)       # NCHW like PyTorch

    # f32 compute here (tight check); use compute_dtype=jnp.bfloat16 on
    # v5e/v6e/v7x for bf16 MXU inputs (loosen the tolerance accordingly).
    out = sfe_forward(params, x, num_res_blocks, res_scale,
                      compute_dtype=jnp.float32)
    out = jax.block_until_ready(out)

    ref = sfe_reference(params, x, num_res_blocks, res_scale)
    # Tolerance covers the MXU's default (possibly bf16-pass) handling of f32
    # matmul operands; with full-f32 passes the observed error is ~1e-6.
    np.testing.assert_allclose(np.asarray(out), np.asarray(ref),
                               rtol=2e-2, atol=2e-2)
    print("KERNEL_OK")
</pallas_src>

<mosaic_0001>
module attributes {stable_mosaic.version = 11 : i64} {
  func.func @probe(%arg0: memref<8x128xf32, #tpu.memory_space<vmem>>, %arg1: memref<8x128xf32, #tpu.memory_space<vmem>>) attributes {dimension_semantics = [], scalar_prefetch = 0 : i64, scratch_operands = 0 : i64, tpu.core_type = #tpu.core_type<tc>} {
    %c0 = arith.constant 0 : index
    %c0_0 = arith.constant 0 : index
    %0 = vector.load %arg0[%c0, %c0_0] : memref<8x128xf32, #tpu.memory_space<vmem>>, vector<8x128xf32>
    %c1_i32 = arith.constant 1 : i32
    %1 = tpu.dynamic_rotate %0 by %c1_i32 dim 1 : vector<8x128xf32>, i32 -> vector<8x128xf32>
    %c0_1 = arith.constant 0 : index
    %c0_2 = arith.constant 0 : index
    %2 = vector.load %arg1[%c0_1, %c0_2] : memref<8x128xf32, #tpu.memory_space<vmem>>, vector<8x128xf32>
    tpu.vector_store %arg1[%c0_1, %c0_2], %1 {strides = array<i32>} : memref<8x128xf32, #tpu.memory_space<vmem>>, vector<8x128xf32>,
    return
  }
}

</mosaic_0001>

<bundles_post_ra>
// kernel: tpu_custom_call.1
= control target key start
LH: loop header
LB: loop body
LE: loop exit
PB: predicated region body
PF: predicated region fallthrough
CT: control target
= control target key end

     0   :  { %6 = vsyncpa [#allocation3], 0  ;;  %s128_s0 = inlined_call_operand.hbm [shape: f32[8,128], index: 0, kind: input, shape index: {}]   ;;  %s129_s1 = inlined_call_operand.hbm [shape: f32[8,128], index: 1, kind: output, shape index: {}]  }
   0x1   :  { %7 = vsyncpa [#allocation4], 0  ;;  %s91_s6 = smov [#allocation2]   ;;  %s43_s10 = scalar_lea.hbm %s128_s0, 128 }
   0x2   :  { %s14_s7 = sshll.u32 %s91_s6, 4  ;;  %p44_p0 = scmp.ne.s32.totalorder %s128_s0, %s43_s10  ;;  %s15_s7 = int_to_ptr.vmem [resolvable:$true] %s14_s7 }
   0x3   :  { %p47_p1 = scmp.lt.u32.totalorder %s43_s10, %s128_s0 }
   0x5   :  { %p49_p2 = pnand %p47_p1, %p44_p0 }
   0x7   :  { %52 = shalt.err (!%p49_p2)
}
   0x8   :  { %s53_s15 = scalar_lea.vmem %s15_s7, 128  ;;  %p58_p4 = scmp.lt.s32.totalorder %s15_s7, %s15_s7 }
   0x9   :  { %p54_p3 = scmp.ne.s32.totalorder %s15_s7, %s53_s15  ;;  %p59_p5 = scmp.lt.s32.totalorder %s53_s15, %s53_s15 }
   0xb   :  { %p60_p6 = por %p59_p5, %p58_p4 }
   0xd   :  { %p61_p7 = pnand %p60_p6, %p54_p3 }
   0xf   :  { %64 = shalt.err (!%p61_p7)
}
  0x10   :  { %17 = dma.hbm_to_vmem [thread:$0]  %s128_s0, 128, %s15_s7, [#allocation3]  }
  0x11   :  { %87 = dma.done.wait [#allocation3], 128  }
  0x12   :  { %88 = vsyncadd [#allocation3], 4294967168  ;;  %v21_v0 = vld [vmem:[#allocation2] sm:$0xff]  ;;  %s92_s18 = smov 1   ;;  %s93_s19 = smov [#allocation5]  }
  0x13   :  { %22 = vrot.lane.b32.xlu0 %v21_v0, %s92_s18  ;;  %s31_s20 = sshll.u32 %s93_s19, 4  ;;  %s32_s20 = int_to_ptr.vmem [resolvable:$true] %s31_s20 }
  0x14   :  { %s65_s21 = scalar_lea.vmem %s32_s20, 128  ;;  %p70_p9 = scmp.lt.s32.totalorder %s32_s20, %s32_s20 }
  0x15   :  { %p66_p8 = scmp.ne.s32.totalorder %s32_s20, %s65_s21  ;;  %p71_p10 = scmp.lt.s32.totalorder %s65_s21, %s65_s21 }
  0x17   :  { %p72_p11 = por %p71_p10, %p70_p9 }
  0x19   :  { %p73_p12 = pnand %p72_p11, %p66_p8 }
  0x85   :  { %v23_v1 = vpop.permute.xlu0 %22 }
  0x86   :  { %24 = vst [vmem:[#allocation5] sm:$0xff] %v23_v1 }
  0x87   :  { %76 = shalt.err (!%p73_p12)
}
  0x88   :  { %s77_s0 = scalar_lea.hbm %s129_s1, 128 }
  0x89   :  { %p78_p13 = scmp.ne.s32.totalorder %s129_s1, %s77_s0  ;;  %p81_p0 = scmp.lt.u32.totalorder %s77_s0, %s129_s1 }
  0x8b   :  { %p83_p1 = pnand %p81_p0, %p78_p13 }
  0x8d   :  { %86 = shalt.err (!%p83_p1)
}
  0x8e   :  { %34 = dma.vmem_to_hbm [thread:$0]  %s32_s20, 128, %s129_s1, [#allocation4]  }
  0x8f   :  { %89 = dma.done.wait [#allocation4], 128  }
  0x90   :  { %90 = vsyncadd [#allocation4], 4294967168 }
  0x91   :  { %38 = vsyncpa [#allocation3], 1 }
  0x92   :  { %39 = vsyncpa [#allocation4], 1 }

</bundles_post_ra>
